<compile_context>
chip_gen: v6e
topology: v6e:2x2x1
jax: 0.10.0
libtpu: 0.0.40
codegen_flags: <defaults>
</compile_context>

<pallas_src>
import jax
import jax.numpy as jnp
from jax.experimental import pallas as pl
from jax.experimental.pallas import tpu as pltpu


def _adapter_kernel(x_ref, w1_ref, w2_ref, o_ref):
    # Cast activations in-kernel (avoids a materialized casted copy in HBM).
    x = x_ref[...].astype(w1_ref.dtype)
    h = jnp.dot(x, w1_ref[...], preferred_element_type=jnp.float32)
    h = jnp.maximum(h, 0.0)                      # ReLU on f32 accumulator
    y = jnp.dot(h.astype(w2_ref.dtype), w2_ref[...],
                preferred_element_type=jnp.float32)
    o_ref[...] = jnp.maximum(y, 0.0).astype(o_ref.dtype)


def _round_up(x, m):
    return (x + m - 1) // m * m


def _vmem_capacity_bytes():
    """Physical VMEM of the local chip; conservative v7x default on failure."""
    try:
        cap = getattr(pltpu.get_tpu_info(), "vmem_capacity_bytes", None)
        if cap:
            return int(cap)
    except Exception:
        pass
    return 64 * 1024 * 1024


def adapter_forward(x, fc1_weight, fc2_weight, *,
                    compute_dtype=jnp.bfloat16,
                    out_dtype=None,
                    max_block_rows=1024):
    """CLIP Adapter forward: relu(relu(x @ W1.T) @ W2.T).

    x:          (..., C_in)
    fc1_weight: (C_hid, C_in)   -- nn.Linear layout (out_features, in_features)
    fc2_weight: (C_in, C_hid)
    returns     (..., C_in) in out_dtype (default: x.dtype)
    """
    orig_shape = x.shape
    c_in = orig_shape[-1]
    c_hid = fc1_weight.shape[0]
    assert fc1_weight.shape == (c_hid, c_in)
    assert fc2_weight.shape == (c_in, c_hid)

    x2 = x.reshape(-1, c_in)
    n = x2.shape[0]

    if compute_dtype is None:
        compute_dtype = x.dtype
    if out_dtype is None:
        out_dtype = x.dtype

    x_item = jnp.dtype(x2.dtype).itemsize
    c_item = jnp.dtype(compute_dtype).itemsize
    o_item = jnp.dtype(out_dtype).itemsize

    # Sublane granule for the row axis of the x tile (f32->8, bf16->16, ...).
    sub = max(8, 32 // x_item)

    # Generation-aware VMEM budget / limit (v5e/v6e: 128 MiB, v7x: 64 MiB).
    vmem_cap = _vmem_capacity_bytes()
    vmem_budget = int(vmem_cap * 0.75)
    vmem_limit = int(vmem_cap * 0.85)

    def _vmem_bytes(br):
        x_tile = br * c_in * x_item * 2            # double-buffered input tile
        x_cast = br * c_in * c_item                # in-kernel casted x
        h_f32 = br * c_hid * 4                     # 1st matmul f32 accumulator
        h_cast = br * c_hid * c_item               # casted h for 2nd matmul
        y_f32 = br * c_in * 4                      # 2nd matmul f32 accumulator
        o_tile = br * c_in * o_item * 2            # double-buffered output tile
        w_res = 2 * c_in * c_hid * c_item * 2      # resident weights (2 bufs)
        return x_tile + x_cast + h_f32 + h_cast + y_f32 + o_tile + w_res

    # ---- pick the row tile --------------------------------------------------
    min_split = 256  # don't split into multiple grid steps below this per step
    if n < 2 * min_split:
        # Small batch: a single full-extent row block (exempt from the 8-row
        # divisibility rule) -- no padded rows, no wasted MXU work / stores.
        block_rows = n
    else:
        # Aim for >= 2 grid steps so the "parallel" axis shards rows across
        # the two TensorCores on v7x; cap by max_block_rows; sublane-align.
        block_rows = min(max_block_rows, _round_up(pl.cdiv(n, 2), sub))

    # Halve (sublane-aligned) until the working set fits the VMEM budget.
    while block_rows > sub and _vmem_bytes(block_rows) > vmem_budget:
        block_rows = _round_up(max(sub, block_rows // 2), sub)
    # TODO(synk): for very large c_in (>= ~4K) the resident, double-buffered
    # weights alone can exceed the budget; that case needs a second grid axis
    # tiling the output columns of W2 (and single-buffered weights).

    grid = (pl.cdiv(n, block_rows),)

    # Host-side weight prep only (tiny, done once): transpose to (in, out) so
    # the kernel does plain x @ W, and cast to the compute dtype.
    w1 = fc1_weight.T.astype(compute_dtype)   # (c_in, c_hid)
    w2 = fc2_weight.T.astype(compute_dtype)   # (c_hid, c_in)

    flops = 2 * 2 * n * c_in * c_hid          # two matmuls
    bytes_accessed = (n * c_in * (x_item + o_item)      # x read + out write
                      + 2 * c_in * c_hid * c_item)      # resident weights

    out2 = pl.pallas_call(
        _adapter_kernel,
        out_shape=jax.ShapeDtypeStruct((n, c_in), out_dtype),
        grid_spec=pltpu.PrefetchScalarGridSpec(
            num_scalar_prefetch=0,
            grid=grid,
            in_specs=[
                # Row-tiled activations (ragged last block is masked by
                # Pallas); weights resident via constant index_maps.
                pl.BlockSpec((block_rows, c_in), lambda i: (i, 0)),
                pl.BlockSpec((c_in, c_hid), lambda i: (0, 0)),
                pl.BlockSpec((c_hid, c_in), lambda i: (0, 0)),
            ],
            out_specs=pl.BlockSpec((block_rows, c_in), lambda i: (i, 0)),
        ),
        compiler_params=pltpu.CompilerParams(
            dimension_semantics=("parallel",),
            vmem_limit_bytes=vmem_limit,
        ),
        cost_estimate=pl.CostEstimate(flops=int(flops), transcendentals=0,
                                      bytes_accessed=int(bytes_accessed)),
    )(x2, w1, w2)

    return out2.reshape(orig_shape[:-1] + (c_in,))


def _reference(x, fc1_weight, fc2_weight):
    h = jnp.maximum(x @ fc1_weight.T, 0.0)
    return jnp.maximum(h @ fc2_weight.T, 0.0)


if __name__ == "__main__":
    # Small shapes consistent with the module: c_in=32, reduction=4 -> hidden=8.
    N, C_IN, REDUCTION = 16, 32, 4
    C_HID = C_IN // REDUCTION

    key = jax.random.PRNGKey(0)
    kx, k1, k2 = jax.random.split(key, 3)

    x = jax.random.normal(kx, (N, C_IN), dtype=jnp.float32)
    # nn.Linear weight layout: (out_features, in_features)
    fc1_w = jax.random.normal(k1, (C_HID, C_IN), dtype=jnp.float32) * 0.1
    fc2_w = jax.random.normal(k2, (C_IN, C_HID), dtype=jnp.float32) * 0.1

    # 1) exact-precision path (f32 end to end) vs. reference
    out_f32 = jax.block_until_ready(
        adapter_forward(x, fc1_w, fc2_w, compute_dtype=jnp.float32))
    ref_f32 = _reference(x, fc1_w, fc2_w)
    assert out_f32.shape == (N, C_IN)
    assert jnp.allclose(out_f32, ref_f32, atol=1e-5, rtol=1e-5), \
        "f32 mismatch vs reference"

    # 2) default fast path (in-kernel bf16 cast feeding the MXU, f32
    #    accumulation) vs. a reference on the same bf16-rounded operands.
    out_bf16 = jax.block_until_ready(adapter_forward(x, fc1_w, fc2_w))
    xb = x.astype(jnp.bfloat16).astype(jnp.float32)
    w1b = fc1_w.astype(jnp.bfloat16).astype(jnp.float32)
    w2b = fc2_w.astype(jnp.bfloat16).astype(jnp.float32)
    ref_bf16 = _reference(xb, w1b, w2b)
    assert out_bf16.shape == (N, C_IN)
    assert jnp.allclose(out_bf16.astype(jnp.float32), ref_bf16,
                        atol=1e-2, rtol=1e-2), "bf16 mismatch vs reference"

    # 3) ragged batch (n not a multiple of the sublane) -- exercises the
    #    unpadded full-extent block path.
    x13 = x[:13]
    out_r = jax.block_until_ready(
        adapter_forward(x13, fc1_w, fc2_w, compute_dtype=jnp.float32))
    assert out_r.shape == (13, C_IN)
    assert jnp.allclose(out_r, _reference(x13, fc1_w, fc2_w),
                        atol=1e-5, rtol=1e-5), "ragged-batch mismatch"

    print("KERNEL_OK")
</pallas_src>

<mosaic_0001>
module attributes {stable_mosaic.version = 11 : i64} {
  func.func @_adapter_kernel(%arg0: i32, %arg1: memref<16x32xf32, #tpu.memory_space<vmem>>, %arg2: memref<32x8xf32, #tpu.memory_space<vmem>>, %arg3: memref<8x32xf32, #tpu.memory_space<vmem>>, %arg4: memref<16x32xf32, #tpu.memory_space<vmem>>) attributes {dimension_semantics = [#tpu.dimension_semantics<parallel>], iteration_bounds = array<i64: 1>, scalar_prefetch = 0 : i64, scratch_operands = 0 : i64, tpu.core_type = #tpu.core_type<tc>, window_params = [{transform_indices = @transform_0, window_bounds = array<i64: 16, 32>}, {pipeline_mode = #tpu.pipeline_mode<synchronous>, transform_indices = @transform_1, window_bounds = array<i64: 32, 8>}, {pipeline_mode = #tpu.pipeline_mode<synchronous>, transform_indices = @transform_2, window_bounds = array<i64: 8, 32>}, {transform_indices = @transform_3, window_bounds = array<i64: 16, 32>}]} {
    %c0 = arith.constant 0 : index
    %c0_0 = arith.constant 0 : index
    %0 = vector.load %arg1[%c0, %c0_0] : memref<16x32xf32, #tpu.memory_space<vmem>>, vector<16x32xf32>
    %c0_1 = arith.constant 0 : index
    %c0_2 = arith.constant 0 : index
    %1 = vector.load %arg2[%c0_1, %c0_2] : memref<32x8xf32, #tpu.memory_space<vmem>>, vector<32x8xf32>
    %cst = arith.constant dense<0.000000e+00> : vector<16x8xf32>
    %2 = tpu.matmul %0, %1, %cst {dimension_numbers = #tpu.dot_dimension_numbers<[1], [0], [0], [1], [0, 0, 1, 1], [], []>} : vector<16x32xf32>, vector<32x8xf32>, vector<16x8xf32> -> vector<16x8xf32>
    %cst_3 = arith.constant 0.000000e+00 : f32
    %3 = vector.broadcast %cst_3 : f32 to vector<16x8xf32>
    %4 = arith.maximumf %2, %3 : vector<16x8xf32>
    %c0_4 = arith.constant 0 : index
    %c0_5 = arith.constant 0 : index
    %5 = vector.load %arg3[%c0_4, %c0_5] : memref<8x32xf32, #tpu.memory_space<vmem>>, vector<8x32xf32>
    %cst_6 = arith.constant dense<0.000000e+00> : vector<16x32xf32>
    %6 = tpu.matmul %4, %5, %cst_6 {dimension_numbers = #tpu.dot_dimension_numbers<[1], [0], [0], [1], [0, 0, 1, 1], [], []>} : vector<16x8xf32>, vector<8x32xf32>, vector<16x32xf32> -> vector<16x32xf32>
    %cst_7 = arith.constant 0.000000e+00 : f32
    %7 = vector.broadcast %cst_7 : f32 to vector<16x32xf32>
    %8 = arith.maximumf %6, %7 : vector<16x32xf32>
    %c0_8 = arith.constant 0 : index
    %c0_9 = arith.constant 0 : index
    %9 = vector.load %arg4[%c0_8, %c0_9] : memref<16x32xf32, #tpu.memory_space<vmem>>, vector<16x32xf32>
    tpu.vector_store %arg4[%c0_8, %c0_9], %8 {strides = array<i32>} : memref<16x32xf32, #tpu.memory_space<vmem>>, vector<16x32xf32>,
    return
  }
  func.func @transform_0(%arg0: i32) -> (i32, i32) {
    %c0_i32 = arith.constant 0 : i32
    %c0_i32_0 = arith.constant 0 : i32
    return %arg0, %c0_i32 : i32, i32
  }
  func.func @transform_1(%arg0: i32) -> (i32, i32) {
    %c0_i32 = arith.constant 0 : i32
    %c0_i32_0 = arith.constant 0 : i32
    %c0_i32_1 = arith.constant 0 : i32
    return %c0_i32, %c0_i32_0 : i32, i32
  }
  func.func @transform_2(%arg0: i32) -> (i32, i32) {
    %c0_i32 = arith.constant 0 : i32
    %c0_i32_0 = arith.constant 0 : i32
    %c0_i32_1 = arith.constant 0 : i32
    return %c0_i32, %c0_i32_0 : i32, i32
  }
  func.func @transform_3(%arg0: i32) -> (i32, i32) {
    %c0_i32 = arith.constant 0 : i32
    %c0_i32_0 = arith.constant 0 : i32
    return %arg0, %c0_i32 : i32, i32
  }
}

</mosaic_0001>

<bundles_post_ra>
// kernel: tpu_custom_call.1
= control target key start
LH: loop header
LB: loop body
LE: loop exit
PB: predicated region body
PF: predicated region fallthrough
CT: control target
= control target key end

     0   :  { %vm21_vm0 = vcmask 261120   ;;  %s313_s0 = inlined_call_operand.vmem [shape: f32[16,32], index: 0, kind: input, shape index: {}]   ;;  %s314_s1 = inlined_call_operand.vmem [shape: f32[32,8], index: 1, kind: input, shape index: {}]   ;;  %s315_s2 = inlined_call_operand.vmem [shape: f32[8,32], index: 2, kind: input, shape index: {}]   ;;  %s316_s3 = inlined_call_operand.hbm [shape: f32[16,32], index: 3, kind: output, shape index: {}]  }
   0x1   :  { %v20_v0 = vld [vmem:[%s314_s1 + $0x18] sm:$0xff]  ;;  %v19_v1 = vld [vmem:[%s314_s1 + $0x10] sm:$0xff]  ;;  %v15_v2 = vld [vmem:[%s313_s0] sm:$0xff] }
   0x2   :  { %221 = vmatprep.subr.mxu0 %v20_v0  ;;  %v18_v3 = vld [vmem:[%s314_s1 + $0x8] sm:$0xff]  ;;  %229 = vmatprep.mubr.msk.f32.mxu0 %vm21_vm0, %v15_v2 }
   0x3   :  { %222 = vmatpush3.msra.mxu0 %v20_v0 }
   0x4   :  { %8 = vsyncpa [#allocation3], 0  ;;  %223 = vmatprep.subr.mxu0 %v19_v1  ;;  %v17_v4 = vld [vmem:[%s314_s1] sm:$0xff]  ;;  %v16_v5 = vld [vmem:[%s313_s0 + $0x8] sm:$0xff]  ;;  %vm106_vm1 = vcmask 64512   ;;  %s262_s1 = smov [#allocation2]  }
   0x5   :  { %224 = vmatpush3.msra.mxu0 %v19_v1  ;;  %v105_v6 = vld [vmem:[%s315_s2] sm:$0xff]  ;;  %s197_s26 = sshll.u32 %s262_s1, 4  ;;  %s198_s26 = int_to_ptr.vmem [resolvable:$true] %s197_s26 }
   0x6   :  { %225 = vmatprep.subr.mxu0 %v18_v3  ;;  %232 = vmatprep.subr.mxu1 %v105_v6  ;;  %s240_s0 = scalar_lea.vmem %s198_s26, 256  ;;  %p245_p1 = scmp.lt.s32.totalorder %s198_s26, %s198_s26 }
   0x7   :  { %226 = vmatpush3.msra.mxu0 %v18_v3  ;;  %233 = vmatpush3.msra.mxu1 %v105_v6  ;;  %p241_p0 = scmp.ne.s32.totalorder %s198_s26, %s240_s0  ;;  %p246_p2 = scmp.lt.s32.totalorder %s240_s0, %s240_s0 }
   0x8   :  { %227 = vmatprep.subr.mxu0 %v17_v4 }
   0x9   :  { %228 = vmatpush3.msra.mxu0 %v17_v4  ;;  %p247_p3 = por %p246_p2, %p245_p1 }
   0xa   :  { %230 = vmatmul.mubr.msk.f32.vlgmr.msra.gmra.mxu0 %vm21_vm0, %v16_v5 }
   0xb   :  { %p248_p4 = pnand %p247_p3, %p241_p0 }
  0xca   :  { %v231_v7 = vpop.f32.mrf.mxu0 }
  0xcb   :  { %v104_v10 = vmax.f32 %v231_v7, 0.0 }
  0xcc   :  { %v94_v8 = vpop.f32.mrf.mxu0 }
  0xcd   :  { %v103_v9 = vmax.f32 %v94_v8, 0.0 }
  0xcf   :  { %234 = vmatprep.mubr.msk.f32.mxu1 %vm106_vm1, %v103_v9 }
  0xd0   :  { %235 = vmatmul.mubr.msk.f32.vlgmr.msra.gmra.mxu1 %vm106_vm1, %v104_v10 }
 0x190   :  { %v236_v11 = vpop.f32.mrf.mxu1 }
 0x191   :  { %v189_v12 = vmax.f32 %v236_v11, 0.0 }
 0x192   :  { %v179_v13 = vpop.f32.mrf.mxu1 }
 0x193   :  { %191 = vst.msk [vmem:[#allocation2 + $0x8] sm:$0xff] %vm21_vm0, %v189_v12  ;;  %v188_v14 = vmax.f32 %v179_v13, 0.0 }
 0x195   :  { %190 = vst.msk [vmem:[#allocation2] sm:$0xff] %vm21_vm0, %v188_v14 }
 0x196   :  { %251 = shalt.err (!%p248_p4)
}
 0x197   :  { %s263_s2 = smov 128   ;;  %s264_s27 = smov 8  }
 0x198   :  { %203 = dma.vmem_to_hbm [thread:$0]  %s198_s26, 256, %s316_s3, [#allocation3], %s263_s2, %s263_s2, %s264_s27  }
 0x199   :  { %260 = dma.done.wait [#allocation3], 256  }
 0x19a   :  { %261 = vsyncadd [#allocation3], 4294967040 }
 0x19b   :  { %207 = vsyncpa [#allocation3], 1 }

</bundles_post_ra>
